<compile_context>
chip_gen: v7x
topology: tpu7x:2x2x1
jax: 0.10.0
libtpu: 0.0.40
codegen_flags: <defaults>
</compile_context>

<pallas_src>
import functools
import math
from typing import Any, NamedTuple

import jax
import jax.numpy as jnp
from jax.experimental import pallas as pl
from jax.experimental.pallas import tpu as pltpu


def _round_up(x, m):
    return ((x + m - 1) // m) * m


# ----------------------------------------------------------------------------
# Kernel: one column tile of Q, `n_steps` fused LSTM-cell applications.
# ----------------------------------------------------------------------------
def _mat_lstm_cell_kernel(w_ref, uh_ref, b_ref, q_ref, out_ref, *,
                          rows, n_steps, compute_dtype):
    """w_ref : (3Rp, Rp) stacked [Wu+Uu; Wr+Ur; Wh]  (compute_dtype, resident)
       uh_ref: (Rp, Rp)  Uh                           (compute_dtype, resident)
       b_ref : (3Rp, TC) stacked [bu; br; bh]         (f32, streamed)
       q_ref : (Rp, TC)  prev_Q column tile           (f32, streamed)
       out   : (Rp, TC)  new_Q column tile            (f32)
    """
    w = w_ref[...]
    uh = uh_ref[...]
    b = b_ref[...]

    def step(_, q):                                    # q: f32 (Rp, TC)
        qc = q.astype(compute_dtype)
        # One stacked MXU matmul covers the update/reset gates (W+U folded)
        # and the Wh @ Q part of the candidate.  Accumulate in f32.
        pre = jnp.dot(w, qc, preferred_element_type=jnp.float32) + b
        # sigmoid(x) = 0.5*(tanh(x/2)+1): tanh runs on the EUP slot instead of
        # the 4-wide VALU divide of the logistic form.
        update = 0.5 * (jnp.tanh(0.5 * pre[0:rows, :]) + 1.0)
        reset = 0.5 * (jnp.tanh(0.5 * pre[rows:2 * rows, :]) + 1.0)
        h_gated = (reset * q).astype(compute_dtype)
        pre_h = pre[2 * rows:3 * rows, :] + jnp.dot(
            uh, h_gated, preferred_element_type=jnp.float32)
        h_cap = jnp.tanh(pre_h)
        # 3-op blend: (1-u)*q + u*h == q + u*(h - q).  Epilogue stays in f32
        # (v5e has no bf16 VPU/EUP).
        return q + update * (h_cap - q)

    q0 = q_ref[...].astype(jnp.float32)
    if n_steps == 1:
        q_final = step(0, q0)
    else:
        # Cap the unroll: full unroll only for short loops, otherwise a small
        # unroll keeps LLO scheduling benefit without vreg/VMEM temp blowup.
        unroll = True if n_steps <= 4 else 2
        q_final = jax.lax.fori_loop(0, n_steps, step, q0, unroll=unroll)
    out_ref[...] = q_final.astype(out_ref.dtype)


# ----------------------------------------------------------------------------
# One-time parameter preparation (hoisted out of the per-call hot path).
# ----------------------------------------------------------------------------
class PreparedParams(NamedTuple):
    w_stacked: Any          # (3Rp, Rp) compute_dtype — [Wu+Uu; Wr+Ur; Wh]
    uh: Any                 # (Rp, Rp)  compute_dtype
    b_stacked: Any          # (3Rp, Cp) f32 — [bu; br; bh], column-padded
    rows: int               # original R
    cols: int               # original C
    rows_p: int             # padded R (multiple of 8 / MXU granule)
    cols_p: int             # padded C (multiple of col_tile)
    col_tile: int           # TC (multiple of 128)
    compute_dtype: Any
    vmem_limit_bytes: int


def prepare_params(params, *, use_bf16_matmul=False, col_tile=1024,
                   contraction_granule=8, vmem_budget_bytes=40 << 20):
    """Fold (W+U) for update/reset, stack gates, pad, cast.  Build ONCE and
    reuse across forward calls — these are separate XLA ops and re-running
    them every step would dominate the fused kernel at small R/C.

    use_bf16_matmul feeds the MXU bf16 operands (f32 accumulate) — valid on
    v5e/v6e/v7x.  For large R set contraction_granule=128 (v5e) / 256
    (v6e/v7x) to fill the MXU systolic depth.
    """
    R = params["Wu"].shape[0]
    C = params["bu"].shape[1]

    # Row padding keeps per-gate slice boundaries 8-sublane aligned (free
    # views) and optionally fills the MXU contraction granule.  Zero padding
    # is self-consistent across steps: padded rows of Q stay exactly 0.
    Rp = _round_up(R, max(8, int(contraction_granule)))

    compute_dtype = jnp.bfloat16 if use_bf16_matmul else jnp.float32
    wbytes = 2 if use_bf16_matmul else 4

    def pad_sq(m):
        return jnp.pad(m, ((0, Rp - R), (0, Rp - R)))

    w_stacked = jnp.concatenate(
        [pad_sq(params["Wu"] + params["Uu"]),
         pad_sq(params["Wr"] + params["Ur"]),
         pad_sq(params["Wh"])], axis=0).astype(compute_dtype)        # (3Rp, Rp)
    uh = pad_sq(params["Uh"]).astype(compute_dtype)                  # (Rp, Rp)
    b_stacked = jnp.concatenate(
        [jnp.pad(params[k], ((0, Rp - R), (0, 0)))
         for k in ("bu", "br", "bh")], axis=0)                        # (3Rp, C)

    # ---- lane-dense column padding + generation-aware column tile ----------
    Cp = _round_up(C, 128)
    TC = min(col_tile, Cp)
    if Cp >= 256:
        # Guarantee >= 2 grid steps so the "parallel" column axis can split
        # across the two v7x TensorCores.
        TC = min(TC, _round_up(Cp // 2, 128))

    def tile_vmem_bytes(tc):
        w_b = (3 * Rp * Rp + Rp * Rp) * wbytes            # single-buffered
        stream = (3 * Rp * tc + 2 * Rp * tc) * 4 * 2      # bias/Q/out, 2 bufs
        temps = 3 * Rp * tc * 4 * 2                       # 'pre' + epilogue
        return w_b + stream + temps

    # Shrink TC until the tile footprint fits the budget (keeps the streamed
    # tiles double-buffered instead of failing on v5e 16 MiB / v7x 64 MiB).
    while TC > 128 and tile_vmem_bytes(TC) > vmem_budget_bytes:
        TC = _round_up(TC // 2, 128)
    Cp = _round_up(Cp, TC)
    if Cp != C:
        b_stacked = jnp.pad(b_stacked, ((0, 0), (0, Cp - C)))

    vmem_limit = int(min(64 << 20, max(2 * tile_vmem_bytes(TC), 32 << 20)))

    return PreparedParams(
        w_stacked=w_stacked, uh=uh, b_stacked=b_stacked,
        rows=R, cols=C, rows_p=Rp, cols_p=Cp, col_tile=TC,
        compute_dtype=compute_dtype, vmem_limit_bytes=vmem_limit)


# ----------------------------------------------------------------------------
# Forward call (hot path: only pads Q and launches the fused kernel).
# ----------------------------------------------------------------------------
def mat_lstm_cell(prev_Q, prepared: PreparedParams, *, n_steps=1):
    """Apply the mat_LSTM_cell `n_steps` times inside one pallas_call.
    n_steps=1 reproduces the PyTorch module's forward exactly."""
    R, C = prepared.rows, prepared.cols
    Rp, Cp, TC = prepared.rows_p, prepared.cols_p, prepared.col_tile
    assert prev_Q.shape == (R, C)

    q_p = prev_Q
    if (Rp, Cp) != (R, C):
        q_p = jnp.pad(prev_Q, ((0, Rp - R), (0, Cp - C)))

    grid = (Cp // TC,)
    kernel = functools.partial(
        _mat_lstm_cell_kernel, rows=Rp, n_steps=int(n_steps),
        compute_dtype=prepared.compute_dtype)

    def launch(single_buffer_weights):
        # Resident weights: constant index_map -> never re-DMA'd; Buffered(1)
        # drops the second (useless) buffer and halves their VMEM footprint.
        w_mode = ({"pipeline_mode": pl.Buffered(1)}
                  if single_buffer_weights else {})
        return pl.pallas_call(
            kernel,
            out_shape=jax.ShapeDtypeStruct((Rp, Cp), jnp.float32),
            grid=grid,
            in_specs=[
                pl.BlockSpec((3 * Rp, Rp), lambda j: (0, 0), **w_mode),
                pl.BlockSpec((Rp, Rp), lambda j: (0, 0), **w_mode),
                pl.BlockSpec((3 * Rp, TC), lambda j: (0, j)),   # bias tile
                pl.BlockSpec((Rp, TC), lambda j: (0, j)),       # Q tile
            ],
            out_specs=pl.BlockSpec((Rp, TC), lambda j: (0, j)),
            compiler_params=pltpu.CompilerParams(
                dimension_semantics=("parallel",),
                vmem_limit_bytes=prepared.vmem_limit_bytes),
        )(prepared.w_stacked, prepared.uh, prepared.b_stacked, q_p)

    try:
        out_padded = launch(True)
    except Exception:
        # Fallback for Pallas versions without pipeline_mode support:
        # identical semantics, default double-buffered weights.
        out_padded = launch(False)

    return out_padded[:R, :C]


# ----------------------------------------------------------------------------
# Init + pure-JAX reference
# ----------------------------------------------------------------------------
def init_params(key, rows, cols):
    """Matches mat_LSTM_gate.reset_param: W, U ~ U(-1/sqrt(rows), 1/sqrt(rows));
    bias = zeros(rows, cols)."""
    stdv = 1.0 / math.sqrt(rows)
    keys = jax.random.split(key, 6)
    u = lambda k: jax.random.uniform(k, (rows, rows), jnp.float32, -stdv, stdv)
    return {
        "Wu": u(keys[0]), "Uu": u(keys[1]), "bu": jnp.zeros((rows, cols), jnp.float32),
        "Wr": u(keys[2]), "Ur": u(keys[3]), "br": jnp.zeros((rows, cols), jnp.float32),
        "Wh": u(keys[4]), "Uh": u(keys[5]), "bh": jnp.zeros((rows, cols), jnp.float32),
    }


def _reference(prev_Q, p):
    """Pure-JAX reference mirroring the PyTorch forward (full-f32 matmuls)."""
    hp = jax.lax.Precision.HIGHEST
    mm = lambda a, b: jnp.matmul(a, b, precision=hp)
    sig, tanh = jax.nn.sigmoid, jnp.tanh
    update = sig(mm(p["Wu"], prev_Q) + mm(p["Uu"], prev_Q) + p["bu"])
    reset = sig(mm(p["Wr"], prev_Q) + mm(p["Ur"], prev_Q) + p["br"])
    h_cap = tanh(mm(p["Wh"], prev_Q) + mm(p["Uh"], reset * prev_Q) + p["bh"])
    return (1.0 - update) * prev_Q + update * h_cap


if __name__ == "__main__":
    # args.rows = 32, args.cols = 16 (small synthetic config)
    ROWS, COLS = 32, 16

    key = jax.random.PRNGKey(0)
    k_q, k_p = jax.random.split(key)

    prev_Q = jax.random.normal(k_q, (ROWS, COLS), jnp.float32)
    params = init_params(k_p, ROWS, COLS)

    # One-time preparation (stacking / folding / padding / casting) — reused
    # across every forward call below.
    prepared = prepare_params(params)

    # --- single step: matches the PyTorch module's forward -------------------
    # Tolerance allows for MXU pass-precision of the f32 matmul path; a
    # structural error would be orders of magnitude larger.
    new_Q = jax.block_until_ready(mat_lstm_cell(prev_Q, prepared))
    ref = _reference(prev_Q, params)
    assert new_Q.shape == (ROWS, COLS)
    assert jnp.allclose(new_Q, ref, atol=5e-3, rtol=5e-3), "mismatch vs reference"

    # --- multi-step fused launch (T cell applications inside one kernel) -----
    T = 4
    q_multi = jax.block_until_ready(mat_lstm_cell(prev_Q, prepared, n_steps=T))
    ref_multi = prev_Q
    for _ in range(T):
        ref_multi = _reference(ref_multi, params)
    assert jnp.allclose(q_multi, ref_multi, atol=1e-2, rtol=1e-2), \
        "multi-step mismatch vs reference"

    # --- bf16 MXU-operand path (valid on v5e/v6e/v7x); looser tolerance ------
    prepared_bf16 = prepare_params(params, use_bf16_matmul=True)
    q_bf16 = jax.block_until_ready(mat_lstm_cell(prev_Q, prepared_bf16))
    assert jnp.allclose(q_bf16, ref, atol=5e-2, rtol=5e-2), \
        "bf16 path mismatch vs reference"

    # TODO(synk): TopK submodule is constructed in __init__ but never used in
    # mat_LSTM_cell.forward, so it is intentionally not implemented here.
    print("KERNEL_OK")
</pallas_src>

<mosaic_0001>
module attributes {stable_mosaic.version = 11 : i64} {
  func.func @_mat_lstm_cell_kernel(%arg0: i32, %arg1: memref<96x32xf32, #tpu.memory_space<vmem>>, %arg2: memref<32x32xf32, #tpu.memory_space<vmem>>, %arg3: memref<96x128xf32, #tpu.memory_space<vmem>>, %arg4: memref<32x128xf32, #tpu.memory_space<vmem>>, %arg5: memref<32x128xf32, #tpu.memory_space<vmem>>) attributes {dimension_semantics = [#tpu.dimension_semantics<parallel>], iteration_bounds = array<i64: 1>, scalar_prefetch = 0 : i64, scratch_operands = 0 : i64, tpu.core_type = #tpu.core_type<tc>, window_params = [{pipeline_mode = #tpu.pipeline_mode<synchronous>, transform_indices = @transform_0, window_bounds = array<i64: 96, 32>}, {pipeline_mode = #tpu.pipeline_mode<synchronous>, transform_indices = @transform_1, window_bounds = array<i64: 32, 32>}, {transform_indices = @transform_2, window_bounds = array<i64: 96, 128>}, {transform_indices = @transform_3, window_bounds = array<i64: 32, 128>}, {transform_indices = @transform_4, window_bounds = array<i64: 32, 128>}]} {
    %c0 = arith.constant 0 : index
    %c0_0 = arith.constant 0 : index
    %0 = vector.load %arg1[%c0, %c0_0] : memref<96x32xf32, #tpu.memory_space<vmem>>, vector<96x32xf32>
    %c0_1 = arith.constant 0 : index
    %c0_2 = arith.constant 0 : index
    %1 = vector.load %arg2[%c0_1, %c0_2] : memref<32x32xf32, #tpu.memory_space<vmem>>, vector<32x32xf32>
    %c0_3 = arith.constant 0 : index
    %c0_4 = arith.constant 0 : index
    %2 = vector.load %arg3[%c0_3, %c0_4] : memref<96x128xf32, #tpu.memory_space<vmem>>, vector<96x128xf32>
    %c0_5 = arith.constant 0 : index
    %c0_6 = arith.constant 0 : index
    %3 = vector.load %arg4[%c0_5, %c0_6] : memref<32x128xf32, #tpu.memory_space<vmem>>, vector<32x128xf32>
    %cst = arith.constant dense<0.000000e+00> : vector<96x128xf32>
    %4 = tpu.matmul %0, %3, %cst {dimension_numbers = #tpu.dot_dimension_numbers<[1], [0], [0], [1], [0, 0, 1, 1], [], []>} : vector<96x32xf32>, vector<32x128xf32>, vector<96x128xf32> -> vector<96x128xf32>
    %5 = arith.addf %4, %2 : vector<96x128xf32>
    %6 = vector.extract_strided_slice %5 {offsets = [0, 0], sizes = [32, 128], strides = [1, 1]} : vector<96x128xf32> to vector<32x128xf32>
    %cst_7 = arith.constant 5.000000e-01 : f32
    %7 = vector.broadcast %cst_7 : f32 to vector<32x128xf32>
    %8 = arith.mulf %7, %6 : vector<32x128xf32>
    %9 = math.tanh %8 : vector<32x128xf32>
    %cst_8 = arith.constant 1.000000e+00 : f32
    %10 = vector.broadcast %cst_8 : f32 to vector<32x128xf32>
    %11 = arith.addf %9, %10 : vector<32x128xf32>
    %cst_9 = arith.constant 5.000000e-01 : f32
    %12 = vector.broadcast %cst_9 : f32 to vector<32x128xf32>
    %13 = arith.mulf %12, %11 : vector<32x128xf32>
    %14 = vector.extract_strided_slice %5 {offsets = [32, 0], sizes = [32, 128], strides = [1, 1]} : vector<96x128xf32> to vector<32x128xf32>
    %cst_10 = arith.constant 5.000000e-01 : f32
    %15 = vector.broadcast %cst_10 : f32 to vector<32x128xf32>
    %16 = arith.mulf %15, %14 : vector<32x128xf32>
    %17 = math.tanh %16 : vector<32x128xf32>
    %cst_11 = arith.constant 1.000000e+00 : f32
    %18 = vector.broadcast %cst_11 : f32 to vector<32x128xf32>
    %19 = arith.addf %17, %18 : vector<32x128xf32>
    %cst_12 = arith.constant 5.000000e-01 : f32
    %20 = vector.broadcast %cst_12 : f32 to vector<32x128xf32>
    %21 = arith.mulf %20, %19 : vector<32x128xf32>
    %22 = arith.mulf %21, %3 : vector<32x128xf32>
    %23 = vector.extract_strided_slice %5 {offsets = [64, 0], sizes = [32, 128], strides = [1, 1]} : vector<96x128xf32> to vector<32x128xf32>
    %cst_13 = arith.constant dense<0.000000e+00> : vector<32x128xf32>
    %24 = tpu.matmul %1, %22, %cst_13 {dimension_numbers = #tpu.dot_dimension_numbers<[1], [0], [0], [1], [0, 0, 1, 1], [], []>} : vector<32x32xf32>, vector<32x128xf32>, vector<32x128xf32> -> vector<32x128xf32>
    %25 = arith.addf %23, %24 : vector<32x128xf32>
    %26 = math.tanh %25 : vector<32x128xf32>
    %27 = arith.subf %26, %3 : vector<32x128xf32>
    %28 = arith.mulf %13, %27 : vector<32x128xf32>
    %29 = arith.addf %3, %28 : vector<32x128xf32>
    %c0_14 = arith.constant 0 : index
    %c0_15 = arith.constant 0 : index
    %30 = vector.load %arg5[%c0_14, %c0_15] : memref<32x128xf32, #tpu.memory_space<vmem>>, vector<32x128xf32>
    tpu.vector_store %arg5[%c0_14, %c0_15], %29 {strides = array<i32>} : memref<32x128xf32, #tpu.memory_space<vmem>>, vector<32x128xf32>,
    return
  }
  func.func @transform_0(%arg0: i32) -> (i32, i32) {
    %c0_i32 = arith.constant 0 : i32
    %c0_i32_0 = arith.constant 0 : i32
    %c0_i32_1 = arith.constant 0 : i32
    return %c0_i32, %c0_i32_0 : i32, i32
  }
  func.func @transform_1(%arg0: i32) -> (i32, i32) {
    %c0_i32 = arith.constant 0 : i32
    %c0_i32_0 = arith.constant 0 : i32
    %c0_i32_1 = arith.constant 0 : i32
    return %c0_i32, %c0_i32_0 : i32, i32
  }
  func.func @transform_2(%arg0: i32) -> (i32, i32) {
    %c0_i32 = arith.constant 0 : i32
    %c0_i32_0 = arith.constant 0 : i32
    return %c0_i32, %arg0 : i32, i32
  }
  func.func @transform_3(%arg0: i32) -> (i32, i32) {
    %c0_i32 = arith.constant 0 : i32
    %c0_i32_0 = arith.constant 0 : i32
    return %c0_i32, %arg0 : i32, i32
  }
  func.func @transform_4(%arg0: i32) -> (i32, i32) {
    %c0_i32 = arith.constant 0 : i32
    %c0_i32_0 = arith.constant 0 : i32
    return %c0_i32, %arg0 : i32, i32
  }
}

module attributes {stable_mosaic.version = 11 : i64} {
  func.func @_mat_lstm_cell_kernel(%arg0: i32, %arg1: memref<96x32xf32, #tpu.memory_space<vmem>>, %arg2: memref<32x32xf32, #tpu.memory_space<vmem>>, %arg3: memref<96x128xf32, #tpu.memory_space<vmem>>, %arg4: memref<32x128xf32, #tpu.memory_space<vmem>>, %arg5: memref<32x128xf32, #tpu.memory_space<vmem>>) attributes {dimension_semantics = [#tpu.dimension_semantics<parallel>], iteration_bounds = array<i64: 1>, scalar_prefetch = 0 : i64, scratch_operands = 0 : i64, tpu.core_type = #tpu.core_type<tc>, window_params = [{pipeline_mode = #tpu.pipeline_mode<synchronous>, transform_indices = @transform_0, window_bounds = array<i64: 96, 32>}, {pipeline_mode = #tpu.pipeline_mode<synchronous>, transform_indices = @transform_1, window_bounds = array<i64: 32, 32>}, {transform_indices = @transform_2, window_bounds = array<i64: 96, 128>}, {transform_indices = @transform_3, window_bounds = array<i64: 32, 128>}, {transform_indices = @transform_4, window_bounds = array<i64: 32, 128>}]} {
    %c0 = arith.constant 0 : index
    %c0_0 = arith.constant 0 : index
    %0 = vector.load %arg1[%c0, %c0_0] : memref<96x32xf32, #tpu.memory_space<vmem>>, vector<96x32xf32>
    %c0_1 = arith.constant 0 : index
    %c0_2 = arith.constant 0 : index
    %1 = vector.load %arg2[%c0_1, %c0_2] : memref<32x32xf32, #tpu.memory_space<vmem>>, vector<32x32xf32>
    %c0_3 = arith.constant 0 : index
    %c0_4 = arith.constant 0 : index
    %2 = vector.load %arg3[%c0_3, %c0_4] : memref<96x128xf32, #tpu.memory_space<vmem>>, vector<96x128xf32>
    %c0_5 = arith.constant 0 : index
    %c0_6 = arith.constant 0 : index
    %3 = vector.load %arg4[%c0_5, %c0_6] : memref<32x128xf32, #tpu.memory_space<vmem>>, vector<32x128xf32>
    %cst = arith.constant dense<0.000000e+00> : vector<96x128xf32>
    %4 = tpu.matmul %0, %3, %cst {dimension_numbers = #tpu.dot_dimension_numbers<[1], [0], [0], [1], [0, 0, 1, 1], [], []>} : vector<96x32xf32>, vector<32x128xf32>, vector<96x128xf32> -> vector<96x128xf32>
    %5 = arith.addf %4, %2 : vector<96x128xf32>
    %6 = vector.extract_strided_slice %5 {offsets = [0, 0], sizes = [32, 128], strides = [1, 1]} : vector<96x128xf32> to vector<32x128xf32>
    %cst_7 = arith.constant 5.000000e-01 : f32
    %7 = vector.broadcast %cst_7 : f32 to vector<32x128xf32>
    %8 = arith.mulf %7, %6 : vector<32x128xf32>
    %9 = math.tanh %8 : vector<32x128xf32>
    %cst_8 = arith.constant 1.000000e+00 : f32
    %10 = vector.broadcast %cst_8 : f32 to vector<32x128xf32>
    %11 = arith.addf %9, %10 : vector<32x128xf32>
    %cst_9 = arith.constant 5.000000e-01 : f32
    %12 = vector.broadcast %cst_9 : f32 to vector<32x128xf32>
    %13 = arith.mulf %12, %11 : vector<32x128xf32>
    %14 = vector.extract_strided_slice %5 {offsets = [32, 0], sizes = [32, 128], strides = [1, 1]} : vector<96x128xf32> to vector<32x128xf32>
    %cst_10 = arith.constant 5.000000e-01 : f32
    %15 = vector.broadcast %cst_10 : f32 to vector<32x128xf32>
    %16 = arith.mulf %15, %14 : vector<32x128xf32>
    %17 = math.tanh %16 : vector<32x128xf32>
    %cst_11 = arith.constant 1.000000e+00 : f32
    %18 = vector.broadcast %cst_11 : f32 to vector<32x128xf32>
    %19 = arith.addf %17, %18 : vector<32x128xf32>
    %cst_12 = arith.constant 5.000000e-01 : f32
    %20 = vector.broadcast %cst_12 : f32 to vector<32x128xf32>
    %21 = arith.mulf %20, %19 : vector<32x128xf32>
    %22 = arith.mulf %21, %3 : vector<32x128xf32>
    %23 = vector.extract_strided_slice %5 {offsets = [64, 0], sizes = [32, 128], strides = [1, 1]} : vector<96x128xf32> to vector<32x128xf32>
    %cst_13 = arith.constant dense<0.000000e+00> : vector<32x128xf32>
    %24 = tpu.matmul %1, %22, %cst_13 {dimension_numbers = #tpu.dot_dimension_numbers<[1], [0], [0], [1], [0, 0, 1, 1], [], []>} : vector<32x32xf32>, vector<32x128xf32>, vector<32x128xf32> -> vector<32x128xf32>
    %25 = arith.addf %23, %24 : vector<32x128xf32>
    %26 = math.tanh %25 : vector<32x128xf32>
    %27 = arith.subf %26, %3 : vector<32x128xf32>
    %28 = arith.mulf %13, %27 : vector<32x128xf32>
    %29 = arith.addf %3, %28 : vector<32x128xf32>
    %c0_14 = arith.constant 0 : index
    %c0_15 = arith.constant 0 : index
    %30 = vector.load %arg5[%c0_14, %c0_15] : memref<32x128xf32, #tpu.memory_space<vmem>>, vector<32x128xf32>
    tpu.vector_store %arg5[%c0_14, %c0_15], %29 {strides = array<i32>} : memref<32x128xf32, #tpu.memory_space<vmem>>, vector<32x128xf32>,
    return
  }
  func.func @transform_0(%arg0: i32) -> (i32, i32) {
    %c0_i32 = arith.constant 0 : i32
    %c0_i32_0 = arith.constant 0 : i32
    %c0_i32_1 = arith.constant 0 : i32
    return %c0_i32, %c0_i32_0 : i32, i32
  }
  func.func @transform_1(%arg0: i32) -> (i32, i32) {
    %c0_i32 = arith.constant 0 : i32
    %c0_i32_0 = arith.constant 0 : i32
    %c0_i32_1 = arith.constant 0 : i32
    return %c0_i32, %c0_i32_0 : i32, i32
  }
  func.func @transform_2(%arg0: i32) -> (i32, i32) {
    %c0_i32 = arith.constant 0 : i32
    %c0_i32_0 = arith.constant 0 : i32
    return %c0_i32, %arg0 : i32, i32
  }
  func.func @transform_3(%arg0: i32) -> (i32, i32) {
    %c0_i32 = arith.constant 0 : i32
    %c0_i32_0 = arith.constant 0 : i32
    return %c0_i32, %arg0 : i32, i32
  }
  func.func @transform_4(%arg0: i32) -> (i32, i32) {
    %c0_i32 = arith.constant 0 : i32
    %c0_i32_0 = arith.constant 0 : i32
    return %c0_i32, %arg0 : i32, i32
  }
}

</mosaic_0001>

<bundles_post_ra>
// kernel: tpu_custom_call.1
= control target key start
LH: loop header
LB: loop body
LE: loop exit
PB: predicated region body
PF: predicated region fallthrough
CT: control target
= control target key end

     0   :  { %9 = vsyncpa [#allocation3], 0  ;;  %s767_s0 = inlined_call_operand.vmem [shape: f32[96,32], index: 0, kind: input, shape index: {}]   ;;  %s768_s1 = inlined_call_operand.vmem [shape: f32[32,32], index: 1, kind: input, shape index: {}]   ;;  %s769_s2 = inlined_call_operand.vmem [shape: f32[96,128], index: 2, kind: input, shape index: {}]   ;;  %s770_s3 = inlined_call_operand.hbm [shape: f32[32,128], index: 3, kind: input, shape index: {}]   ;;  %s771_s4 = inlined_call_operand.hbm [shape: f32[32,128], index: 4, kind: output, shape index: {}]  }
   0x1   :  { %10 = vsyncpa [#allocation4], 0  ;;  %s584_s15 = smov [#allocation2]   ;;  %s536_s19 = scalar_lea.hbm %s770_s3, 512 }
   0x2   :  { %s22_s16 = sshll.u32 %s584_s15, 4  ;;  %p537_p0 = scmp.ne.s32.totalorder %s770_s3, %s536_s19  ;;  %s23_s16 = int_to_ptr.vmem [resolvable:$true] %s22_s16 }
   0x3   :  { %p540_p1 = scmp.lt.u32.totalorder %s536_s19, %s770_s3 }
   0x5   :  { %p542_p2 = pnand %p540_p1, %p537_p0 }
   0x7   :  { %545 = shalt.err (!%p542_p2)
}
   0x8   :  { %s546_s24 = scalar_lea.vmem %s23_s16, 512  ;;  %p551_p4 = scmp.lt.s32.totalorder %s23_s16, %s23_s16 }
   0x9   :  { %p547_p3 = scmp.ne.s32.totalorder %s23_s16, %s546_s24  ;;  %p552_p5 = scmp.lt.s32.totalorder %s546_s24, %s546_s24 }
   0xb   :  { %p553_p6 = por %p552_p5, %p551_p4 }
   0xd   :  { %p554_p7 = pnand %p553_p6, %p547_p3 }
   0xf   :  { %557 = shalt.err (!%p554_p7)
}
  0x10   :  { %s585_s25 = smov 128   ;;  %s586_s26 = smov 8  }
  0x11   :  { %28 = dma.hbm_to_vmem [thread:$0]  %s770_s3, 512, %s23_s16, [#allocation3], %s585_s25, %s585_s25, %s586_s26  }
  0x12   :  { %580 = dma.done.wait [#allocation3], 512  }
  0x13   :  { %581 = vsyncadd [#allocation3], 4294966784  ;;  %vm64_vm0 = vcmask 261120   ;;  %v628_v0 = vld [vmem:[#allocation2] sm:$0xff]  ;;  %v630_v1 = vld [vmem:[#allocation2 + $0x8] sm:$0xff] }
  0x14   :  { %v632_v2 = vld [vmem:[#allocation2 + $0x10] sm:$0xff]  ;;  %v480_v3 = vpack.c.bf16 %v630_v1, %v628_v0  ;;  %v636_v4 = vld [vmem:[#allocation2 + $0x18] sm:$0xff]  ;;  %v36_v5 = vld [vmem:[%s767_s0 + $0x20] sm:$0xff] }
  0x15   :  { %v484_v6 = vpack.c.bf16 %v636_v4, %v632_v2  ;;  %454 = vmatprep.mubr.msk.f32.mxu1 %vm64_vm0, %v36_v5  ;;  %v37_v7 = vld [vmem:[%s767_s0 + $0x28] sm:$0xff]  ;;  %v38_v8 = vld [vmem:[%s767_s0 + $0x30] sm:$0xff]  ;;  %v39_v9 = vld [vmem:[%s767_s0 + $0x38] sm:$0xff] }
  0x16   :  { %496 = vmatprep.subr.bf16.mxu1 %v480_v3  ;;  %481 = vmatprep.subr.bf16.mxu0 %v480_v3  ;;  %v32_v10 = vld [vmem:[%s767_s0] sm:$0xff]  ;;  %v33_v11 = vld [vmem:[%s767_s0 + $0x8] sm:$0xff]  ;;  %v34_v12 = vld [vmem:[%s767_s0 + $0x10] sm:$0xff] }
  0x17   :  { %498 = vmatpush3.bf16.msra.mxu1 %v480_v3  ;;  %483 = vmatpush3.bf16.msra.mxu0 %v480_v3  ;;  %v35_v13 = vld [vmem:[%s767_s0 + $0x18] sm:$0xff]  ;;  %v40_v14 = vld [vmem:[%s767_s0 + $0x40] sm:$0xff]  ;;  %v41_v15 = vld [vmem:[%s767_s0 + $0x48] sm:$0xff] }
  0x18   :  { %497 = vmatprep.subr.bf16.mxu1 %v484_v6  ;;  %485 = vmatprep.subr.bf16.mxu0 %v484_v6  ;;  %v44_v16 = vld [vmem:[%s768_s1] sm:$0xff]  ;;  %v42_v17 = vld [vmem:[%s767_s0 + $0x50] sm:$0xff]  ;;  %v43_v18 = vld [vmem:[%s767_s0 + $0x58] sm:$0xff] }
  0x19   :  { %448 = vmatprep.mubr.msk.f32.mxu0 %vm64_vm0, %v32_v10  ;;  %v53_v19 = vld [vmem:[%s769_s2 + $0x28] sm:$0xff]  ;;  %v52_v20 = vld [vmem:[%s769_s2 + $0x20] sm:$0xff]  ;;  %v55_v25 = vld [vmem:[%s769_s2 + $0x38] sm:$0xff] }
  0x1a   :  { %v54_v27 = vld [vmem:[%s769_s2 + $0x30] sm:$0xff]  ;;  %v45_v53 = vld [vmem:[%s768_s1 + $0x8] sm:$0xff]  ;;  %v47_v55 = vld [vmem:[%s768_s1 + $0x18] sm:$0xff] }
  0x1b   :  { %499 = vmatpush3.bf16.msra.mxu1 %v484_v6  ;;  %487 = vmatpush3.bf16.msra.mxu0 %v484_v6  ;;  %v46_v54 = vld [vmem:[%s768_s1 + $0x10] sm:$0xff]  ;;  %v49_v3 = vld [vmem:[%s769_s2 + $0x8] sm:$0xff]  ;;  %v48_v5 = vld [vmem:[%s769_s2] sm:$0xff] }
  0x1e   :  { %455 = vmatmul.mubr.msk.f32.vlgmr.msra.gmra.mrb[0].mxu1 %vm64_vm0, %v37_v7  ;;  %449 = vmatmul.mubr.msk.f32.vlgmr.msra.gmra.mrb[0].mxu0 %vm64_vm0, %v33_v11 }
  0x1f   :  { %457 = vmatprep.mubr.msk.f32.mxu1 %vm64_vm0, %v38_v8  ;;  %451 = vmatprep.mubr.msk.f32.mxu0 %vm64_vm0, %v34_v12  ;;  %v51_v8 = vld [vmem:[%s769_s2 + $0x18] sm:$0xff] }
  0x22   :  { %458 = vmatmul.mubr.msk.f32.gmra.mrb[2].mxu1 %vm64_vm0, %v39_v9  ;;  %452 = vmatmul.mubr.msk.f32.gmra.mrb[2].mxu0 %vm64_vm0, %v35_v13  ;;  %v50_v9 = vld [vmem:[%s769_s2 + $0x10] sm:$0xff] }
  0x23   :  { %460 = vmatprep.mubr.msk.f32.mxu1 %vm64_vm0, %v40_v14  ;;  %474 = vmatprep.mubr.msk.f32.mxu0 %vm64_vm0, %v44_v16  ;;  %v57_v14 = vld [vmem:[%s769_s2 + $0x48] sm:$0xff] }
  0x26   :  { %461 = vmatmul.mubr.msk.f32.gmra.mrb[4].mxu1 %vm64_vm0, %v41_v15  ;;  %v56_v15 = vld [vmem:[%s769_s2 + $0x40] sm:$0xff] }
  0x27   :  { %463 = vmatprep.mubr.msk.f32.mxu1 %vm64_vm0, %v42_v17 }
  0x2a   :  { %464 = vmatmul.mubr.msk.f32.gmra.mrb[6].mxu1 %vm64_vm0, %v43_v18 }
  0xf1   :  { %v456_v21 = vpop.f32.mrb[0].mxu1  ;;  %v450_v56 = vpop.f32.mrb[0].mxu0 }
  0xf2   :  { %v193_v22 = vadd.f32 %v456_v21, %v53_v19  ;;  %v187_v23 = vpop.f32.mrb[1].mxu1  ;;  %v167_v57 = vpop.f32.mrb[1].mxu0  ;;  %v173_v6 = vadd.f32 %v450_v56, %v49_v3  ;;  %v58_v21 = vld [vmem:[%s769_s2 + $0x50] sm:$0xff] }
  0xf3   :  { %v188_v24 = vadd.f32 %v187_v23, %v52_v20  ;;  %v168_v7 = vadd.f32 %v167_v57, %v48_v5  ;;  %v59_v20 = vld [vmem:[%s769_s2 + $0x58] sm:$0xff]  ;;  %s587_s2 = smov [#allocation5]  }
  0xf4   :  { %v243_v26 = vmul.f32 0.5, %v193_v22  ;;  %v227_v10 = vmul.f32 0.5, %v173_v6  ;;  %s388_s6 = sshll.u32 %s587_s2, 4  ;;  %s389_s6 = int_to_ptr.vmem [resolvable:$true] %s388_s6 }
  0xf5   :  { %v242_v28 = vmul.f32 0.5, %v188_v24  ;;  %v459_v29 = vpop.f32.mrb[2].mxu1  ;;  %v453_v58 = vpop.f32.mrb[2].mxu0  ;;  %v226_v12 = vmul.f32 0.5, %v168_v7  ;;  %s558_s7 = scalar_lea.vmem %s389_s6, 512  ;;  %p563_p9 = scmp.lt.s32.totalorder %s389_s6, %s389_s6 }
  0xf6   :  { %512 = vtanh.f32 %v243_v26  ;;  %v203_v30 = vadd.f32 %v459_v29, %v55_v25  ;;  %v197_v31 = vpop.f32.mrb[3].mxu1  ;;  %v177_v59 = vpop.f32.mrb[3].mxu0  ;;  %v183_v11 = vadd.f32 %v453_v58, %v51_v8  ;;  %p559_p8 = scmp.ne.s32.totalorder %s389_s6, %s558_s7  ;;  %p564_p10 = scmp.lt.s32.totalorder %s558_s7, %s558_s7 }
  0xf7   :  { %514 = vtanh.f32 %v242_v28  ;;  %v198_v32 = vadd.f32 %v197_v31, %v54_v27  ;;  %v178_v13 = vadd.f32 %v177_v59, %v50_v9 }
  0xf8   :  { %v245_v33 = vmul.f32 0.5, %v203_v30  ;;  %v229_v16 = vmul.f32 0.5, %v183_v11  ;;  %p565_p11 = por %p564_p10, %p563_p9 }
  0xf9   :  { %v244_v34 = vmul.f32 0.5, %v198_v32  ;;  %v462_v60 = vpop.f32.mrb[4].mxu1  ;;  %v228_v18 = vmul.f32 0.5, %v178_v13 }
  0xfa   :  { %516 = vtanh.f32 %v245_v33  ;;  %v207_v61 = vpop.f32.mrb[5].mxu1  ;;  %v213_v17 = vadd.f32 %v462_v60, %v57_v14  ;;  %p566_p12 = pnand %p565_p11, %p559_p8 }
  0xfb   :  { %518 = vtanh.f32 %v244_v34  ;;  %v208_v19 = vadd.f32 %v207_v61, %v56_v15 }
  0xfc   :  { %520 = vtanh.f32 %v227_v10 }
  0xfd   :  { %v465_v62 = vpop.f32.mrb[6].mxu1  ;;  %522 = vtanh.f32 %v226_v12 }
  0xfe   :  { %v217_v63 = vpop.f32.mrb[7].mxu1  ;;  %524 = vtanh.f32 %v229_v16  ;;  %v223_v25 = vadd.f32 %v465_v62, %v59_v20 }
  0xff   :  { %526 = vtanh.f32 %v228_v18  ;;  %v218_v27 = vadd.f32 %v217_v63, %v58_v21 }
 0x100   :  { %v513_v35 = vpop.eup %512 }
 0x101   :  { %v515_v36 = vpop.eup %514  ;;  %v251_v37 = vadd.f32 1.0, %v513_v35 }
 0x102   :  { %v250_v38 = vadd.f32 1.0, %v515_v36 }
 0x103   :  { %v255_v39 = vmul.f32 0.5, %v251_v37 }
 0x104   :  { %v517_v40 = vpop.eup %516  ;;  %v254_v41 = vmul.f32 0.5, %v250_v38 }
 0x105   :  { %v519_v42 = vpop.eup %518  ;;  %v253_v43 = vadd.f32 1.0, %v517_v40  ;;  %v259_v44 = vmul.f32 %v255_v39, %v630_v1 }
 0x106   :  { %v252_v45 = vadd.f32 1.0, %v519_v42  ;;  %v258_v46 = vmul.f32 %v254_v41, %v628_v0  ;;  %v521_v32 = vpop.eup %520 }
 0x107   :  { %v257_v47 = vmul.f32 0.5, %v253_v43  ;;  %v523_v33 = vpop.eup %522  ;;  %v235_v34 = vadd.f32 1.0, %v521_v32 }
 0x108   :  { %v256_v48 = vmul.f32 0.5, %v252_v45  ;;  %v488_v49 = vpack.c.bf16 %v259_v44, %v258_v46  ;;  %v525_v35 = vpop.eup %524  ;;  %v234_v36 = vadd.f32 1.0, %v523_v33 }
 0x109   :  { %v261_v50 = vmul.f32 %v257_v47, %v636_v4  ;;  %v527_v37 = vpop.eup %526  ;;  %v239_v40 = vmul.f32 0.5, %v235_v34  ;;  %v237_v41 = vadd.f32 1.0, %v525_v35 }
 0x10a   :  { %489 = vmatprep.subr.bf16.mxu0 %v488_v49  ;;  %v260_v51 = vmul.f32 %v256_v48, %v632_v2  ;;  %v238_v43 = vmul.f32 0.5, %v234_v36  ;;  %v236_v44 = vadd.f32 1.0, %v527_v37 }
 0x10b   :  { %491 = vmatpush3.bf16.msra.mxu0 %v488_v49 }
 0x10c   :  { %v492_v52 = vpack.c.bf16 %v261_v50, %v260_v51  ;;  %v241_v50 = vmul.f32 0.5, %v237_v41 }
 0x10e   :  { %493 = vmatprep.subr.bf16.mxu0 %v492_v52 }
 0x10f   :  { %495 = vmatpush3.bf16.msra.mxu0 %v492_v52 }
 0x112   :  { %475 = vmatmul.mubr.msk.f32.vlgmr.msra.gmra.mrb[4].mxu0 %vm64_vm0, %v45_v53  ;;  %v240_v53 = vmul.f32 0.5, %v236_v44 }
 0x113   :  { %477 = vmatprep.mubr.msk.f32.mxu0 %vm64_vm0, %v46_v54 }
 0x116   :  { %478 = vmatmul.mubr.msk.f32.gmra.mrb[6].mxu0 %vm64_vm0, %v47_v55 }
 0x1e5   :  { %v476_v22 = vpop.f32.mrb[4].mxu0 }
 0x1e6   :  { %v360_v23 = vadd.f32 %v476_v22, %v213_v17  ;;  %v340_v24 = vpop.f32.mrb[5].mxu0 }
 0x1e7   :  { %v359_v26 = vadd.f32 %v340_v24, %v208_v19 }
 0x1e8   :  { %528 = vtanh.f32 %v360_v23 }
 0x1e9   :  { %530 = vtanh.f32 %v359_v26  ;;  %v479_v28 = vpop.f32.mrb[6].mxu0 }
 0x1ea   :  { %v362_v29 = vadd.f32 %v479_v28, %v223_v25  ;;  %v350_v30 = vpop.f32.mrb[7].mxu0 }
 0x1eb   :  { %v361_v31 = vadd.f32 %v350_v30, %v218_v27 }
 0x1ec   :  { %532 = vtanh.f32 %v362_v29 }
 0x1ed   :  { %534 = vtanh.f32 %v361_v31 }
 0x1f2   :  { %v529_v38 = vpop.eup %528 }
 0x1f3   :  { %v531_v39 = vpop.eup %530  ;;  %v368_v42 = vsub.f32 %v529_v38, %v630_v1 }
 0x1f4   :  { %v367_v45 = vsub.f32 %v531_v39, %v628_v0 }
 0x1f5   :  { %v372_v46 = vmul.f32 %v368_v42, %v239_v40 }
 0x1f6   :  { %v533_v47 = vpop.eup %532  ;;  %v371_v48 = vmul.f32 %v367_v45, %v238_v43 }
 0x1f7   :  { %v535_v49 = vpop.eup %534  ;;  %v370_v51 = vsub.f32 %v533_v47, %v636_v4  ;;  %v376_v52 = vadd.f32 %v372_v46, %v630_v1 }
 0x1f8   :  { %v369_v54 = vsub.f32 %v535_v49, %v632_v2  ;;  %v375_v55 = vadd.f32 %v371_v48, %v628_v0 }
 0x1f9   :  { %v374_v56 = vmul.f32 %v370_v51, %v241_v50  ;;  %380 = vst [vmem:[#allocation5 + $0x8] sm:$0xff] %v376_v52 }
 0x1fa   :  { %v373_v57 = vmul.f32 %v369_v54, %v240_v53  ;;  %379 = vst [vmem:[#allocation5] sm:$0xff] %v375_v55 }
 0x1fb   :  { %v378_v58 = vadd.f32 %v374_v56, %v636_v4 }
 0x1fc   :  { %v377_v59 = vadd.f32 %v373_v57, %v632_v2 }
 0x1fd   :  { %382 = vst [vmem:[#allocation5 + $0x18] sm:$0xff] %v378_v58 }
 0x1fe   :  { %381 = vst [vmem:[#allocation5 + $0x10] sm:$0xff] %v377_v59 }
 0x1ff   :  { %569 = shalt.err (!%p566_p12)
}
 0x200   :  { %s570_s9 = scalar_lea.hbm %s771_s4, 512 }
 0x201   :  { %p571_p13 = scmp.ne.s32.totalorder %s771_s4, %s570_s9  ;;  %p574_p0 = scmp.lt.u32.totalorder %s570_s9, %s771_s4 }
 0x203   :  { %p576_p1 = pnand %p574_p0, %p571_p13 }
 0x205   :  { %579 = shalt.err (!%p576_p1)
}
 0x206   :  { %394 = dma.vmem_to_hbm [thread:$0]  %s389_s6, 512, %s771_s4, [#allocation4], %s585_s25, %s585_s25, %s586_s26  }
 0x207   :  { %582 = dma.done.wait [#allocation4], 512  }
 0x208   :  { %583 = vsyncadd [#allocation4], 4294966784 }
 0x209   :  { %398 = vsyncpa [#allocation3], 1 }
 0x20a   :  { %399 = vsyncpa [#allocation4], 1 }

// kernel: tpu_custom_call.1
= control target key start
LH: loop header
LB: loop body
LE: loop exit
PB: predicated region body
PF: predicated region fallthrough
CT: control target
= control target key end

     0   :  { %9 = vsyncpa [#allocation3], 0  ;;  %s767_s0 = inlined_call_operand.vmem [shape: f32[96,32], index: 0, kind: input, shape index: {}]   ;;  %s768_s1 = inlined_call_operand.vmem [shape: f32[32,32], index: 1, kind: input, shape index: {}]   ;;  %s769_s2 = inlined_call_operand.vmem [shape: f32[96,128], index: 2, kind: input, shape index: {}]   ;;  %s770_s3 = inlined_call_operand.hbm [shape: f32[32,128], index: 3, kind: input, shape index: {}]   ;;  %s771_s4 = inlined_call_operand.hbm [shape: f32[32,128], index: 4, kind: output, shape index: {}]  }
   0x1   :  { %10 = vsyncpa [#allocation4], 0  ;;  %s584_s15 = smov [#allocation2]   ;;  %s536_s19 = scalar_lea.hbm %s770_s3, 512 }
   0x2   :  { %s22_s16 = sshll.u32 %s584_s15, 4  ;;  %p537_p0 = scmp.ne.s32.totalorder %s770_s3, %s536_s19  ;;  %s23_s16 = int_to_ptr.vmem [resolvable:$true] %s22_s16 }
   0x3   :  { %p540_p1 = scmp.lt.u32.totalorder %s536_s19, %s770_s3 }
   0x5   :  { %p542_p2 = pnand %p540_p1, %p537_p0 }
   0x7   :  { %545 = shalt.err (!%p542_p2)
}
   0x8   :  { %s546_s24 = scalar_lea.vmem %s23_s16, 512  ;;  %p551_p4 = scmp.lt.s32.totalorder %s23_s16, %s23_s16 }
   0x9   :  { %p547_p3 = scmp.ne.s32.totalorder %s23_s16, %s546_s24  ;;  %p552_p5 = scmp.lt.s32.totalorder %s546_s24, %s546_s24 }
   0xb   :  { %p553_p6 = por %p552_p5, %p551_p4 }
   0xd   :  { %p554_p7 = pnand %p553_p6, %p547_p3 }
   0xf   :  { %557 = shalt.err (!%p554_p7)
}
  0x10   :  { %s585_s25 = smov 128   ;;  %s586_s26 = smov 8  }
  0x11   :  { %28 = dma.hbm_to_vmem [thread:$0]  %s770_s3, 512, %s23_s16, [#allocation3], %s585_s25, %s585_s25, %s586_s26  }
  0x12   :  { %580 = dma.done.wait [#allocation3], 512  }
  0x13   :  { %581 = vsyncadd [#allocation3], 4294966784  ;;  %vm64_vm0 = vcmask 261120   ;;  %v628_v0 = vld [vmem:[#allocation2] sm:$0xff]  ;;  %v630_v1 = vld [vmem:[#allocation2 + $0x8] sm:$0xff] }
  0x14   :  { %v632_v2 = vld [vmem:[#allocation2 + $0x10] sm:$0xff]  ;;  %v480_v3 = vpack.c.bf16 %v630_v1, %v628_v0  ;;  %v636_v4 = vld [vmem:[#allocation2 + $0x18] sm:$0xff]  ;;  %v36_v5 = vld [vmem:[%s767_s0 + $0x20] sm:$0xff] }
  0x15   :  { %v484_v6 = vpack.c.bf16 %v636_v4, %v632_v2  ;;  %454 = vmatprep.mubr.msk.f32.mxu1 %vm64_vm0, %v36_v5  ;;  %v37_v7 = vld [vmem:[%s767_s0 + $0x28] sm:$0xff]  ;;  %v38_v8 = vld [vmem:[%s767_s0 + $0x30] sm:$0xff]  ;;  %v39_v9 = vld [vmem:[%s767_s0 + $0x38] sm:$0xff] }
  0x16   :  { %496 = vmatprep.subr.bf16.mxu1 %v480_v3  ;;  %481 = vmatprep.subr.bf16.mxu0 %v480_v3  ;;  %v32_v10 = vld [vmem:[%s767_s0] sm:$0xff]  ;;  %v33_v11 = vld [vmem:[%s767_s0 + $0x8] sm:$0xff]  ;;  %v34_v12 = vld [vmem:[%s767_s0 + $0x10] sm:$0xff] }
  0x17   :  { %498 = vmatpush3.bf16.msra.mxu1 %v480_v3  ;;  %483 = vmatpush3.bf16.msra.mxu0 %v480_v3  ;;  %v35_v13 = vld [vmem:[%s767_s0 + $0x18] sm:$0xff]  ;;  %v40_v14 = vld [vmem:[%s767_s0 + $0x40] sm:$0xff]  ;;  %v41_v15 = vld [vmem:[%s767_s0 + $0x48] sm:$0xff] }
  0x18   :  { %497 = vmatprep.subr.bf16.mxu1 %v484_v6  ;;  %485 = vmatprep.subr.bf16.mxu0 %v484_v6  ;;  %v44_v16 = vld [vmem:[%s768_s1] sm:$0xff]  ;;  %v42_v17 = vld [vmem:[%s767_s0 + $0x50] sm:$0xff]  ;;  %v43_v18 = vld [vmem:[%s767_s0 + $0x58] sm:$0xff] }
  0x19   :  { %448 = vmatprep.mubr.msk.f32.mxu0 %vm64_vm0, %v32_v10  ;;  %v53_v19 = vld [vmem:[%s769_s2 + $0x28] sm:$0xff]  ;;  %v52_v20 = vld [vmem:[%s769_s2 + $0x20] sm:$0xff]  ;;  %v55_v25 = vld [vmem:[%s769_s2 + $0x38] sm:$0xff] }
  0x1a   :  { %v54_v27 = vld [vmem:[%s769_s2 + $0x30] sm:$0xff]  ;;  %v45_v53 = vld [vmem:[%s768_s1 + $0x8] sm:$0xff]  ;;  %v47_v55 = vld [vmem:[%s768_s1 + $0x18] sm:$0xff] }
  0x1b   :  { %499 = vmatpush3.bf16.msra.mxu1 %v484_v6  ;;  %487 = vmatpush3.bf16.msra.mxu0 %v484_v6  ;;  %v46_v54 = vld [vmem:[%s768_s1 + $0x10] sm:$0xff]  ;;  %v49_v3 = vld [vmem:[%s769_s2 + $0x8] sm:$0xff]  ;;  %v48_v5 = vld [vmem:[%s769_s2] sm:$0xff] }
  0x1e   :  { %455 = vmatmul.mubr.msk.f32.vlgmr.msra.gmra.mrb[0].mxu1 %vm64_vm0, %v37_v7  ;;  %449 = vmatmul.mubr.msk.f32.vlgmr.msra.gmra.mrb[0].mxu0 %vm64_vm0, %v33_v11 }
  0x1f   :  { %457 = vmatprep.mubr.msk.f32.mxu1 %vm64_vm0, %v38_v8  ;;  %451 = vmatprep.mubr.msk.f32.mxu0 %vm64_vm0, %v34_v12  ;;  %v51_v8 = vld [vmem:[%s769_s2 + $0x18] sm:$0xff] }
  0x22   :  { %458 = vmatmul.mubr.msk.f32.gmra.mrb[2].mxu1 %vm64_vm0, %v39_v9  ;;  %452 = vmatmul.mubr.msk.f32.gmra.mrb[2].mxu0 %vm64_vm0, %v35_v13  ;;  %v50_v9 = vld [vmem:[%s769_s2 + $0x10] sm:$0xff] }
  0x23   :  { %460 = vmatprep.mubr.msk.f32.mxu1 %vm64_vm0, %v40_v14  ;;  %474 = vmatprep.mubr.msk.f32.mxu0 %vm64_vm0, %v44_v16  ;;  %v57_v14 = vld [vmem:[%s769_s2 + $0x48] sm:$0xff] }
  0x26   :  { %461 = vmatmul.mubr.msk.f32.gmra.mrb[4].mxu1 %vm64_vm0, %v41_v15  ;;  %v56_v15 = vld [vmem:[%s769_s2 + $0x40] sm:$0xff] }
  0x27   :  { %463 = vmatprep.mubr.msk.f32.mxu1 %vm64_vm0, %v42_v17 }
  0x2a   :  { %464 = vmatmul.mubr.msk.f32.gmra.mrb[6].mxu1 %vm64_vm0, %v43_v18 }
  0xf1   :  { %v456_v21 = vpop.f32.mrb[0].mxu1  ;;  %v450_v56 = vpop.f32.mrb[0].mxu0 }
  0xf2   :  { %v193_v22 = vadd.f32 %v456_v21, %v53_v19  ;;  %v187_v23 = vpop.f32.mrb[1].mxu1  ;;  %v167_v57 = vpop.f32.mrb[1].mxu0  ;;  %v173_v6 = vadd.f32 %v450_v56, %v49_v3  ;;  %v58_v21 = vld [vmem:[%s769_s2 + $0x50] sm:$0xff] }
  0xf3   :  { %v188_v24 = vadd.f32 %v187_v23, %v52_v20  ;;  %v168_v7 = vadd.f32 %v167_v57, %v48_v5  ;;  %v59_v20 = vld [vmem:[%s769_s2 + $0x58] sm:$0xff]  ;;  %s587_s2 = smov [#allocation5]  }
  0xf4   :  { %v243_v26 = vmul.f32 0.5, %v193_v22  ;;  %v227_v10 = vmul.f32 0.5, %v173_v6  ;;  %s388_s6 = sshll.u32 %s587_s2, 4  ;;  %s389_s6 = int_to_ptr.vmem [resolvable:$true] %s388_s6 }
  0xf5   :  { %v242_v28 = vmul.f32 0.5, %v188_v24  ;;  %v459_v29 = vpop.f32.mrb[2].mxu1  ;;  %v453_v58 = vpop.f32.mrb[2].mxu0  ;;  %v226_v12 = vmul.f32 0.5, %v168_v7  ;;  %s558_s7 = scalar_lea.vmem %s389_s6, 512  ;;  %p563_p9 = scmp.lt.s32.totalorder %s389_s6, %s389_s6 }
  0xf6   :  { %512 = vtanh.f32 %v243_v26  ;;  %v203_v30 = vadd.f32 %v459_v29, %v55_v25  ;;  %v197_v31 = vpop.f32.mrb[3].mxu1  ;;  %v177_v59 = vpop.f32.mrb[3].mxu0  ;;  %v183_v11 = vadd.f32 %v453_v58, %v51_v8  ;;  %p559_p8 = scmp.ne.s32.totalorder %s389_s6, %s558_s7  ;;  %p564_p10 = scmp.lt.s32.totalorder %s558_s7, %s558_s7 }
  0xf7   :  { %514 = vtanh.f32 %v242_v28  ;;  %v198_v32 = vadd.f32 %v197_v31, %v54_v27  ;;  %v178_v13 = vadd.f32 %v177_v59, %v50_v9 }
  0xf8   :  { %v245_v33 = vmul.f32 0.5, %v203_v30  ;;  %v229_v16 = vmul.f32 0.5, %v183_v11  ;;  %p565_p11 = por %p564_p10, %p563_p9 }
  0xf9   :  { %v244_v34 = vmul.f32 0.5, %v198_v32  ;;  %v462_v60 = vpop.f32.mrb[4].mxu1  ;;  %v228_v18 = vmul.f32 0.5, %v178_v13 }
  0xfa   :  { %516 = vtanh.f32 %v245_v33  ;;  %v207_v61 = vpop.f32.mrb[5].mxu1  ;;  %v213_v17 = vadd.f32 %v462_v60, %v57_v14  ;;  %p566_p12 = pnand %p565_p11, %p559_p8 }
  0xfb   :  { %518 = vtanh.f32 %v244_v34  ;;  %v208_v19 = vadd.f32 %v207_v61, %v56_v15 }
  0xfc   :  { %520 = vtanh.f32 %v227_v10 }
  0xfd   :  { %v465_v62 = vpop.f32.mrb[6].mxu1  ;;  %522 = vtanh.f32 %v226_v12 }
  0xfe   :  { %v217_v63 = vpop.f32.mrb[7].mxu1  ;;  %524 = vtanh.f32 %v229_v16  ;;  %v223_v25 = vadd.f32 %v465_v62, %v59_v20 }
  0xff   :  { %526 = vtanh.f32 %v228_v18  ;;  %v218_v27 = vadd.f32 %v217_v63, %v58_v21 }
 0x100   :  { %v513_v35 = vpop.eup %512 }
 0x101   :  { %v515_v36 = vpop.eup %514  ;;  %v251_v37 = vadd.f32 1.0, %v513_v35 }
 0x102   :  { %v250_v38 = vadd.f32 1.0, %v515_v36 }
 0x103   :  { %v255_v39 = vmul.f32 0.5, %v251_v37 }
 0x104   :  { %v517_v40 = vpop.eup %516  ;;  %v254_v41 = vmul.f32 0.5, %v250_v38 }
 0x105   :  { %v519_v42 = vpop.eup %518  ;;  %v253_v43 = vadd.f32 1.0, %v517_v40  ;;  %v259_v44 = vmul.f32 %v255_v39, %v630_v1 }
 0x106   :  { %v252_v45 = vadd.f32 1.0, %v519_v42  ;;  %v258_v46 = vmul.f32 %v254_v41, %v628_v0  ;;  %v521_v32 = vpop.eup %520 }
 0x107   :  { %v257_v47 = vmul.f32 0.5, %v253_v43  ;;  %v523_v33 = vpop.eup %522  ;;  %v235_v34 = vadd.f32 1.0, %v521_v32 }
 0x108   :  { %v256_v48 = vmul.f32 0.5, %v252_v45  ;;  %v488_v49 = vpack.c.bf16 %v259_v44, %v258_v46  ;;  %v525_v35 = vpop.eup %524  ;;  %v234_v36 = vadd.f32 1.0, %v523_v33 }
 0x109   :  { %v261_v50 = vmul.f32 %v257_v47, %v636_v4  ;;  %v527_v37 = vpop.eup %526  ;;  %v239_v40 = vmul.f32 0.5, %v235_v34  ;;  %v237_v41 = vadd.f32 1.0, %v525_v35 }
 0x10a   :  { %489 = vmatprep.subr.bf16.mxu0 %v488_v49  ;;  %v260_v51 = vmul.f32 %v256_v48, %v632_v2  ;;  %v238_v43 = vmul.f32 0.5, %v234_v36  ;;  %v236_v44 = vadd.f32 1.0, %v527_v37 }
 0x10b   :  { %491 = vmatpush3.bf16.msra.mxu0 %v488_v49 }
 0x10c   :  { %v492_v52 = vpack.c.bf16 %v261_v50, %v260_v51  ;;  %v241_v50 = vmul.f32 0.5, %v237_v41 }
 0x10e   :  { %493 = vmatprep.subr.bf16.mxu0 %v492_v52 }
 0x10f   :  { %495 = vmatpush3.bf16.msra.mxu0 %v492_v52 }
 0x112   :  { %475 = vmatmul.mubr.msk.f32.vlgmr.msra.gmra.mrb[4].mxu0 %vm64_vm0, %v45_v53  ;;  %v240_v53 = vmul.f32 0.5, %v236_v44 }
 0x113   :  { %477 = vmatprep.mubr.msk.f32.mxu0 %vm64_vm0, %v46_v54 }
 0x116   :  { %478 = vmatmul.mubr.msk.f32.gmra.mrb[6].mxu0 %vm64_vm0, %v47_v55 }
 0x1e5   :  { %v476_v22 = vpop.f32.mrb[4].mxu0 }
 0x1e6   :  { %v360_v23 = vadd.f32 %v476_v22, %v213_v17  ;;  %v340_v24 = vpop.f32.mrb[5].mxu0 }
 0x1e7   :  { %v359_v26 = vadd.f32 %v340_v24, %v208_v19 }
 0x1e8   :  { %528 = vtanh.f32 %v360_v23 }
 0x1e9   :  { %530 = vtanh.f32 %v359_v26  ;;  %v479_v28 = vpop.f32.mrb[6].mxu0 }
 0x1ea   :  { %v362_v29 = vadd.f32 %v479_v28, %v223_v25  ;;  %v350_v30 = vpop.f32.mrb[7].mxu0 }
 0x1eb   :  { %v361_v31 = vadd.f32 %v350_v30, %v218_v27 }
 0x1ec   :  { %532 = vtanh.f32 %v362_v29 }
 0x1ed   :  { %534 = vtanh.f32 %v361_v31 }
 0x1f2   :  { %v529_v38 = vpop.eup %528 }
 0x1f3   :  { %v531_v39 = vpop.eup %530  ;;  %v368_v42 = vsub.f32 %v529_v38, %v630_v1 }
 0x1f4   :  { %v367_v45 = vsub.f32 %v531_v39, %v628_v0 }
 0x1f5   :  { %v372_v46 = vmul.f32 %v368_v42, %v239_v40 }
 0x1f6   :  { %v533_v47 = vpop.eup %532  ;;  %v371_v48 = vmul.f32 %v367_v45, %v238_v43 }
 0x1f7   :  { %v535_v49 = vpop.eup %534  ;;  %v370_v51 = vsub.f32 %v533_v47, %v636_v4  ;;  %v376_v52 = vadd.f32 %v372_v46, %v630_v1 }
 0x1f8   :  { %v369_v54 = vsub.f32 %v535_v49, %v632_v2  ;;  %v375_v55 = vadd.f32 %v371_v48, %v628_v0 }
 0x1f9   :  { %v374_v56 = vmul.f32 %v370_v51, %v241_v50  ;;  %380 = vst [vmem:[#allocation5 + $0x8] sm:$0xff] %v376_v52 }
 0x1fa   :  { %v373_v57 = vmul.f32 %v369_v54, %v240_v53  ;;  %379 = vst [vmem:[#allocation5] sm:$0xff] %v375_v55 }
 0x1fb   :  { %v378_v58 = vadd.f32 %v374_v56, %v636_v4 }
 0x1fc   :  { %v377_v59 = vadd.f32 %v373_v57, %v632_v2 }
 0x1fd   :  { %382 = vst [vmem:[#allocation5 + $0x18] sm:$0xff] %v378_v58 }
 0x1fe   :  { %381 = vst [vmem:[#allocation5 + $0x10] sm:$0xff] %v377_v59 }
 0x1ff   :  { %569 = shalt.err (!%p566_p12)
}
 0x200   :  { %s570_s9 = scalar_lea.hbm %s771_s4, 512 }
 0x201   :  { %p571_p13 = scmp.ne.s32.totalorder %s771_s4, %s570_s9  ;;  %p574_p0 = scmp.lt.u32.totalorder %s570_s9, %s771_s4 }
 0x203   :  { %p576_p1 = pnand %p574_p0, %p571_p13 }
 0x205   :  { %579 = shalt.err (!%p576_p1)
}
 0x206   :  { %394 = dma.vmem_to_hbm [thread:$0]  %s389_s6, 512, %s771_s4, [#allocation4], %s585_s25, %s585_s25, %s586_s26  }
 0x207   :  { %582 = dma.done.wait [#allocation4], 512  }
 0x208   :  { %583 = vsyncadd [#allocation4], 4294966784 }
 0x209   :  { %398 = vsyncpa [#allocation3], 1 }
 0x20a   :  { %399 = vsyncpa [#allocation4], 1 }

</bundles_post_ra>
